<compile_context>
chip_gen: v5e
topology: v5e:2x2
jax: 0.10.0
libtpu: 0.0.40
codegen_flags: <defaults>
</compile_context>

<pallas_src>
import jax
import jax.numpy as jnp
from jax.experimental import pallas as pl
from jax.experimental.pallas import tpu as pltpu


def _round_up(x, m):
    return ((x + m - 1) // m) * m


def _round_down(x, m):
    return (x // m) * m


# ----------------------------------------------------------------------------
# Pallas kernel: one (tm, tn) output tile of  y = x @ w + b
# ----------------------------------------------------------------------------
def _linear_kernel(x_ref, w_ref, b_ref, o_ref):
    acc = jnp.dot(x_ref[...], w_ref[...], preferred_element_type=jnp.float32)
    o_ref[...] = (acc + b_ref[...].astype(jnp.float32)).astype(o_ref.dtype)


def pallas_linear(x, w, b, *, tm=512, out_dtype=None):
    """x: (M, K), w: (K, N), b: (1, N) -> (M, N).

    Grid = (N_tiles, M_tiles) with M innermost.  By default N_tiles == 1, so
    the whole (K, Np) weight is VMEM-resident (constant block index => it is
    DMA'd once) while (tm, K) activation tiles stream along the inner axis.
    """
    M, K = x.shape
    Kw, N = w.shape
    assert Kw == K
    out_dtype = out_dtype if out_dtype is not None else x.dtype
    isz_in = jnp.dtype(x.dtype).itemsize
    isz_out = jnp.dtype(out_dtype).itemsize

    # --- cheap N padding (weight + bias only) so stores are lane-dense ------
    Np = _round_up(N, 128)
    if Np != N:
        w = jnp.pad(w, ((0, 0), (0, Np - N)))
        b = jnp.pad(b, ((0, 0), (0, Np - N)))

    # --- tile sizing under a cross-generation VMEM budget --------------------
    # v5e/v6e: 128 MiB physical (16/32 MiB scoped default); v7x: 64 MiB
    # physical (32 MiB scoped default).  Budget 40 MiB keeps double-buffering
    # alive everywhere.
    VMEM_BUDGET = 40 * 1024 * 1024

    if M >= 8:
        tm = _round_down(min(tm, M), 8)      # multiple of 8; partial last
    else:                                    # block handled by masking
        tm = M
    tn = Np                                  # whole weight resident by default

    def vmem_need(tm_, tn_):
        # 2x for BlockSpec double buffering of every operand.
        return 2 * (tm_ * K * isz_in + K * tn_ * isz_in + tn_ * 4
                    + tm_ * tn_ * isz_out)

    # Shrink tm first (keep W whole-resident: that is the #1 HBM win), only
    # then split N.
    while vmem_need(tm, tn) > VMEM_BUDGET and tm > 256:
        tm = max(8, _round_down(tm // 2, 8))
    while vmem_need(tm, tn) > VMEM_BUDGET and tn > 512:
        tn = _round_up(tn // 2, 128)
    while vmem_need(tm, tn) > VMEM_BUDGET and tm > 64:
        tm = max(8, _round_down(tm // 2, 8))

    nj = pl.cdiv(Np, tn)                     # N tiles (outer, usually 1)
    ni = pl.cdiv(M, tm)                      # M tiles (inner); no jnp.pad on x

    vmem_limit = int(min(max(vmem_need(tm, tn) * 1.25, 32 * 1024 * 1024),
                         48 * 1024 * 1024))

    cost = pl.CostEstimate(
        flops=2 * M * K * N,
        transcendentals=0,
        bytes_accessed=(nj * M * K * isz_in      # X streamed once per N tile
                        + K * Np * isz_in        # W read once (resident)
                        + Np * 4                 # bias read once
                        + M * Np * isz_out),     # output written once
    )

    out = pl.pallas_call(
        _linear_kernel,
        out_shape=jax.ShapeDtypeStruct((M, Np), out_dtype),
        grid=(nj, ni),                            # i (M) is the inner axis
        in_specs=[
            pl.BlockSpec((tm, K), lambda j, i: (i, 0)),   # x: streams over M
            pl.BlockSpec((K, tn), lambda j, i: (0, j)),   # w: constant inner
            pl.BlockSpec((1, tn), lambda j, i: (0, j)),   # b: constant inner
        ],
        out_specs=pl.BlockSpec((tm, tn), lambda j, i: (i, j)),
        compiler_params=pltpu.CompilerParams(
            dimension_semantics=("parallel", "parallel"),
            vmem_limit_bytes=vmem_limit,
        ),
        cost_estimate=cost,
    )(x, w, b)

    if Np != N:
        out = out[:, :N]
    return out


# ----------------------------------------------------------------------------
# Glue: im2col identical to nn.Unfold(kernel_size=p, stride=s) + rearrange.
# Patch inner order = (channel, kernel_row, kernel_col), exactly like Unfold.
# ----------------------------------------------------------------------------
def unfold_nchw(x, p, s):
    """x: (B, C, H, W) -> (B, L, C*p*p)."""
    B, C, H, W = x.shape
    oh = (H - p) // s + 1
    ow = (W - p) // s + 1
    if s == p and H % p == 0 and W % p == 0:
        # Non-overlapping patches (module default): one transpose copy.
        patches = x.reshape(B, C, oh, p, ow, p)
        patches = patches.transpose(0, 2, 4, 1, 3, 5)        # (B, oh, ow, C, p, p)
        return patches.reshape(B, oh * ow, C * p * p)
    # Overlapping / ragged strides: one vectorized gather.
    ii = (jnp.arange(oh) * s)[:, None] + jnp.arange(p)[None, :]      # (oh, p)
    jj = (jnp.arange(ow) * s)[:, None] + jnp.arange(p)[None, :]      # (ow, p)
    patches = x[:, :, ii[:, None, :, None], jj[None, :, None, :]]    # (B, C, oh, ow, p, p)
    patches = patches.transpose(0, 2, 3, 1, 4, 5)                    # (B, oh, ow, C, p, p)
    return patches.reshape(B, oh * ow, C * p * p)


# ----------------------------------------------------------------------------
# ConvEmbedding forward
# ----------------------------------------------------------------------------
def conv_embedding_forward(x, weight, bias, patch_size, stride=None,
                           compute_dtype=None, tm=512):
    """Reproduces ConvEmbedding.forward.

    x:      (B, C, H, W)
    weight: (dim_out, patch_dim)   -- PyTorch nn.Linear layout
    bias:   (dim_out,)
    compute_dtype: optionally cast matmul inputs (e.g. jnp.bfloat16) — the
        accumulator stays f32 and the output keeps x.dtype.
    returns (B, L, dim_out)
    """
    stride = patch_size if stride is None else stride
    B = x.shape[0]
    patches = unfold_nchw(x, patch_size, stride)              # (B, L, patch_dim)
    L, patch_dim = patches.shape[1], patches.shape[2]
    dim_out = weight.shape[0]

    x2d = patches.reshape(B * L, patch_dim)                   # (M, K), free reshape
    w2d = weight.T                                            # (K, N), small
    b2d = bias.reshape(1, dim_out).astype(jnp.float32)        # (1, N)

    if compute_dtype is not None:
        x2d = x2d.astype(compute_dtype)
        w2d = w2d.astype(compute_dtype)

    y2d = pallas_linear(x2d, w2d, b2d, tm=tm, out_dtype=x.dtype)
    return y2d.reshape(B, L, dim_out)


# ----------------------------------------------------------------------------
# Pure-JAX reference (explicit Python-loop unfold, provably nn.Unfold-ordered)
# ----------------------------------------------------------------------------
def _unfold_ref(x, p, s):
    B, C, H, W = x.shape
    oh = (H - p) // s + 1
    ow = (W - p) // s + 1
    rows = []
    for i in range(oh):
        cols = []
        for j in range(ow):
            patch = x[:, :, i * s:i * s + p, j * s:j * s + p]   # (B, C, p, p)
            cols.append(patch.reshape(B, C * p * p))
        rows.append(jnp.stack(cols, axis=1))
    return jnp.stack(rows, axis=1).reshape(B, oh * ow, C * p * p)


def conv_embedding_ref(x, weight, bias, patch_size, stride=None):
    stride = patch_size if stride is None else stride
    patches = _unfold_ref(x, patch_size, stride)
    return patches @ weight.T + bias


if __name__ == "__main__":
    key = jax.random.PRNGKey(0)

    # --- Test 1: module-sized toy config (single tile, lane-aligned N) ------
    B, C, H, W = 2, 4, 16, 16
    patch_size = 4
    dim_out = 128
    patch_dim = C * patch_size * patch_size                    # 64

    kx, kw, kb, kx2, kw2, kb2, kx3, kw3, kb3 = jax.random.split(key, 9)
    x = jax.random.normal(kx, (B, C, H, W), dtype=jnp.float32)
    bound = 1.0 / (patch_dim ** 0.5)
    weight = jax.random.uniform(kw, (dim_out, patch_dim), jnp.float32,
                                minval=-bound, maxval=bound)
    bias = jax.random.uniform(kb, (dim_out,), jnp.float32,
                              minval=-bound, maxval=bound)

    out = conv_embedding_forward(x, weight, bias, patch_size)
    out = jax.block_until_ready(out)
    ref = conv_embedding_ref(x, weight, bias, patch_size)
    assert out.shape == (B, (H // patch_size) * (W // patch_size), dim_out)
    assert jnp.allclose(out, ref, atol=1e-5, rtol=1e-5)

    # --- Test 2: multiple M tiles + partial trailing M block + N padding ----
    B2, C2, H2, W2 = 2, 3, 36, 36
    p2, dim_out2 = 4, 192                   # patch_dim=48, L=81, M=162, Np=256
    pd2 = C2 * p2 * p2
    x2 = jax.random.normal(kx2, (B2, C2, H2, W2), dtype=jnp.float32)
    b2 = 1.0 / (pd2 ** 0.5)
    w2 = jax.random.uniform(kw2, (dim_out2, pd2), jnp.float32,
                            minval=-b2, maxval=b2)
    bb2 = jax.random.uniform(kb2, (dim_out2,), jnp.float32,
                             minval=-b2, maxval=b2)
    out2 = conv_embedding_forward(x2, w2, bb2, p2, tm=64)       # ni=3, last partial
    out2 = jax.block_until_ready(out2)
    ref2 = conv_embedding_ref(x2, w2, bb2, p2)
    assert out2.shape == (B2, (H2 // p2) * (W2 // p2), dim_out2)
    assert jnp.allclose(out2, ref2, atol=1e-5, rtol=1e-5)

    # --- Test 3: overlapping stride (gather path) + non-multiple-of-8 M -----
    B3, C3, H3, W3 = 1, 3, 12, 12
    p3, s3, dim_out3 = 4, 2, 128            # oh=ow=5, L=25 -> M=25
    pd3 = C3 * p3 * p3
    x3 = jax.random.normal(kx3, (B3, C3, H3, W3), dtype=jnp.float32)
    b3 = 1.0 / (pd3 ** 0.5)
    w3 = jax.random.uniform(kw3, (dim_out3, pd3), jnp.float32,
                            minval=-b3, maxval=b3)
    bb3 = jax.random.uniform(kb3, (dim_out3,), jnp.float32,
                             minval=-b3, maxval=b3)
    out3 = conv_embedding_forward(x3, w3, bb3, p3, stride=s3)
    out3 = jax.block_until_ready(out3)
    ref3 = conv_embedding_ref(x3, w3, bb3, p3, stride=s3)
    assert out3.shape == (B3, 25, dim_out3)
    assert jnp.allclose(out3, ref3, atol=1e-5, rtol=1e-5)

    # --- Test 4: bf16 compute path (f32 accumulator, f32 output) ------------
    out4 = conv_embedding_forward(x, weight, bias, patch_size,
                                  compute_dtype=jnp.bfloat16)
    out4 = jax.block_until_ready(out4)
    assert out4.shape == ref.shape
    assert jnp.allclose(out4, ref, atol=2e-2, rtol=2e-2)

    print("KERNEL_OK")
</pallas_src>

<mosaic_0001>
module attributes {stable_mosaic.version = 11 : i64} {
  func.func @_linear_kernel(%arg0: i32, %arg1: i32, %arg2: memref<32x64xf32, #tpu.memory_space<vmem>>, %arg3: memref<64x128xf32, #tpu.memory_space<vmem>>, %arg4: memref<1x128xf32, #tpu.memory_space<vmem>>, %arg5: memref<32x128xf32, #tpu.memory_space<vmem>>) attributes {dimension_semantics = [#tpu.dimension_semantics<parallel>, #tpu.dimension_semantics<parallel>], iteration_bounds = array<i64: 1, 1>, scalar_prefetch = 0 : i64, scratch_operands = 0 : i64, tpu.core_type = #tpu.core_type<tc>, window_params = [{transform_indices = @transform_0, window_bounds = array<i64: 32, 64>}, {transform_indices = @transform_1, window_bounds = array<i64: 64, 128>}, {transform_indices = @transform_2, window_bounds = array<i64: 1, 128>}, {transform_indices = @transform_3, window_bounds = array<i64: 32, 128>}]} {
    %c0 = arith.constant 0 : index
    %c0_0 = arith.constant 0 : index
    %0 = vector.load %arg2[%c0, %c0_0] : memref<32x64xf32, #tpu.memory_space<vmem>>, vector<32x64xf32>
    %c0_1 = arith.constant 0 : index
    %c0_2 = arith.constant 0 : index
    %1 = vector.load %arg3[%c0_1, %c0_2] : memref<64x128xf32, #tpu.memory_space<vmem>>, vector<64x128xf32>
    %cst = arith.constant dense<0.000000e+00> : vector<32x128xf32>
    %2 = tpu.matmul %0, %1, %cst {dimension_numbers = #tpu.dot_dimension_numbers<[1], [0], [0], [1], [0, 0, 1, 1], [], []>} : vector<32x64xf32>, vector<64x128xf32>, vector<32x128xf32> -> vector<32x128xf32>
    %c0_3 = arith.constant 0 : index
    %c0_4 = arith.constant 0 : index
    %3 = vector.load %arg4[%c0_3, %c0_4] : memref<1x128xf32, #tpu.memory_space<vmem>>, vector<1x128xf32>
    %4 = vector.broadcast %3 : vector<1x128xf32> to vector<32x128xf32>
    %5 = arith.addf %2, %4 : vector<32x128xf32>
    %c0_5 = arith.constant 0 : index
    %c0_6 = arith.constant 0 : index
    %6 = vector.load %arg5[%c0_5, %c0_6] : memref<32x128xf32, #tpu.memory_space<vmem>>, vector<32x128xf32>
    tpu.vector_store %arg5[%c0_5, %c0_6], %5 {strides = array<i32>} : memref<32x128xf32, #tpu.memory_space<vmem>>, vector<32x128xf32>,
    return
  }
  func.func @transform_0(%arg0: i32, %arg1: i32) -> (i32, i32) {
    %c0_i32 = arith.constant 0 : i32
    %c0_i32_0 = arith.constant 0 : i32
    return %arg1, %c0_i32 : i32, i32
  }
  func.func @transform_1(%arg0: i32, %arg1: i32) -> (i32, i32) {
    %c0_i32 = arith.constant 0 : i32
    %c0_i32_0 = arith.constant 0 : i32
    return %c0_i32, %arg0 : i32, i32
  }
  func.func @transform_2(%arg0: i32, %arg1: i32) -> (i32, i32) {
    %c0_i32 = arith.constant 0 : i32
    %c0_i32_0 = arith.constant 0 : i32
    return %c0_i32, %arg0 : i32, i32
  }
  func.func @transform_3(%arg0: i32, %arg1: i32) -> (i32, i32) {
    %c0_i32 = arith.constant 0 : i32
    return %arg1, %arg0 : i32, i32
  }
}

</mosaic_0001>

<bundles_post_ra>
// kernel: tpu_custom_call.1
= control target key start
LH: loop header
LB: loop body
LE: loop exit
PB: predicated region body
PF: predicated region fallthrough
CT: control target
= control target key end

     0   :  { %8 = vsyncpa [#allocation3], 0  ;;  %s287_s0 = inlined_call_operand.hbm [shape: f32[32,64], index: 0, kind: input, shape index: {}]   ;;  %s288_s1 = inlined_call_operand.hbm [shape: f32[64,128], index: 1, kind: input, shape index: {}]   ;;  %s289_s2 = inlined_call_operand.vmem [shape: f32[1,128], index: 2, kind: input, shape index: {}]   ;;  %s290_s3 = inlined_call_operand.hbm [shape: f32[32,128], index: 3, kind: output, shape index: {}]  }
   0x1   :  { %9 = vsyncpa [#allocation6], 0 }
   0x2   :  { %10 = vsyncpa [#allocation4], 0  ;;  %s15_s14 = sshll.u32 %s287_s0, 4  ;;  %s241_s15 = smov [#allocation2]   ;;  %s16_s14 = int_to_ptr.hbm [resolvable:$true] %s15_s14 }
   0x3   :  { %s17_s16 = sshll.u32 %s241_s15, 4  ;;  %s28_s19 = sshll.u32 %s288_s1, 4  ;;  %s18_s16 = int_to_ptr.vmem [resolvable:$true] %s17_s16  ;;  %s29_s19 = int_to_ptr.hbm [resolvable:$true] %s28_s19 }
   0x4   :  { %s242_s20 = smov 128   ;;  %s243_s21 = smov 8  }
   0x5   :  { %23 = dma.hbm_to_vmem [thread:$0]  %s16_s14, 512, %s18_s16, [#allocation3], %s242_s20, %s242_s20, %s243_s21  }
   0x6   :  { %s244_s22 = smov [#allocation5]  }
   0x7   :  { %s30_s23 = sshll.u32 %s244_s22, 4  ;;  %s31_s23 = int_to_ptr.vmem [resolvable:$true] %s30_s23 }
   0x8   :  { %36 = dma.hbm_to_vmem [thread:$0]  %s29_s19, 1024, %s31_s23, [#allocation6], %s242_s20, %s242_s20, %s243_s21  }
   0x9   :  { %235 = dma.done.wait [#allocation3], 512  }
   0xa   :  { %236 = vsyncadd [#allocation3], 4294966784 }
   0xb   :  { %237 = dma.done.wait [#allocation6], 1024  }
   0xc   :  { %238 = vsyncadd [#allocation6], 4294966272  ;;  %v58_v0 = vld [vmem:[#allocation5 + $0x38] sm:$0xff]  ;;  %v57_v1 = vld [vmem:[#allocation5 + $0x30] sm:$0xff]  ;;  %vm63_vm0 = vcmask 523264   ;;  %s245_s24 = smov [#allocation7]  }
   0xd   :  { %134 = vmatpush.msra.mxu2 %v58_v0  ;;  %135 = vmatpush.msra.mxu3 %v58_v0  ;;  %v56_v2 = vld [vmem:[#allocation5 + $0x28] sm:$0xff]  ;;  %v55_v3 = vld [vmem:[#allocation5 + $0x20] sm:$0xff]  ;;  %v54_v4 = vld [vmem:[#allocation5 + $0x18] sm:$0xff]  ;;  %s113_s25 = sshll.u32 %s245_s24, 4  ;;  %s115_s28 = sshll.u32 %s290_s3, 4  ;;  %s114_s25 = int_to_ptr.vmem [resolvable:$true] %s113_s25  ;;  %s116_s28 = int_to_ptr.hbm [resolvable:$true] %s115_s28 }
   0xe   :  { %84 = vmatpush.msra.mxu0 %v58_v0  ;;  %133 = vmatpush.msra.mxu1 %v58_v0  ;;  %v53_v5 = vld [vmem:[#allocation5 + $0x10] sm:$0xff]  ;;  %v52_v6 = vld [vmem:[#allocation5 + $0x8] sm:$0xff]  ;;  %v51_v7 = vld [vmem:[#allocation5] sm:$0xff] }
   0xf   :  { %137 = vmatpush.msra.mxu2 %v57_v1  ;;  %138 = vmatpush.msra.mxu3 %v57_v1  ;;  %v49_v8 = vld [vmem:[#allocation2 + $0x10] sm:$0xff]  ;;  %v50_v9 = vld [vmem:[#allocation2 + $0x18] sm:$0xff]  ;;  %v47_v10 = vld [vmem:[#allocation2] sm:$0xff] }
  0x10   :  { %85 = vmatpush.msra.mxu0 %v57_v1  ;;  %136 = vmatpush.msra.mxu1 %v57_v1  ;;  %v48_v11 = vld [vmem:[#allocation2 + $0x8] sm:$0xff]  ;;  %v162_v12 = vld [vmem:[%s289_s2] ss:$0 sm:$0xff] }
  0x11   :  { %140 = vmatpush.msra.mxu2 %v56_v2  ;;  %141 = vmatpush.msra.mxu3 %v56_v2 }
  0x12   :  { %86 = vmatpush.msra.mxu0 %v56_v2  ;;  %139 = vmatpush.msra.mxu1 %v56_v2 }
  0x13   :  { %143 = vmatpush.msra.mxu2 %v55_v3  ;;  %144 = vmatpush.msra.mxu3 %v55_v3 }
  0x14   :  { %87 = vmatpush.msra.mxu0 %v55_v3  ;;  %142 = vmatpush.msra.mxu1 %v55_v3 }
  0x15   :  { %146 = vmatpush.msra.mxu2 %v54_v4  ;;  %147 = vmatpush.msra.mxu3 %v54_v4 }
  0x16   :  { %88 = vmatpush.msra.mxu0 %v54_v4  ;;  %145 = vmatpush.msra.mxu1 %v54_v4 }
  0x17   :  { %149 = vmatpush.msra.mxu2 %v53_v5  ;;  %150 = vmatpush.msra.mxu3 %v53_v5 }
  0x18   :  { %89 = vmatpush.msra.mxu0 %v53_v5  ;;  %148 = vmatpush.msra.mxu1 %v53_v5 }
  0x19   :  { %152 = vmatpush.msra.mxu2 %v52_v6  ;;  %153 = vmatpush.msra.mxu3 %v52_v6 }
  0x1a   :  { %90 = vmatpush.msra.mxu0 %v52_v6  ;;  %151 = vmatpush.msra.mxu1 %v52_v6 }
  0x1b   :  { %155 = vmatpush.msra.mxu2 %v51_v7  ;;  %156 = vmatpush.msra.mxu3 %v51_v7 }
  0x1c   :  { %131 = vmatmul.msk.f32.vlgmr.msra.gmra.mxu2 %vm63_vm0, %v49_v8  ;;  %132 = vmatmul.msk.f32.vlgmr.msra.gmra.mxu3 %vm63_vm0, %v50_v9 }
  0x1d   :  { %91 = vmatpush.msra.mxu0 %v51_v7  ;;  %154 = vmatpush.msra.mxu1 %v51_v7 }
  0x1e   :  { %129 = vmatmul.msk.f32.vlgmr.msra.gmra.mxu0 %vm63_vm0, %v47_v10  ;;  %130 = vmatmul.msk.f32.vlgmr.msra.gmra.mxu1 %vm63_vm0, %v48_v11 }
  0x9b   :  { %v93_v13 = vpop.f32.mrf.mxu0  ;;  %v96_v14 = vpop.f32.mrf.mxu1 }
  0x9c   :  { %v94_v15 = vadd.f32 %v162_v12, %v93_v13  ;;  %v97_v16 = vadd.f32 %v162_v12, %v96_v14 }
  0x9e   :  { %105 = vst [vmem:[#allocation7] sm:$0xff] %v94_v15 }
  0x9f   :  { %106 = vst [vmem:[#allocation7 + $0x8] sm:$0xff] %v97_v16  ;;  %v99_v17 = vpop.f32.mrf.mxu2  ;;  %v102_v18 = vpop.f32.mrf.mxu3 }
  0xa0   :  { %v100_v19 = vadd.f32 %v162_v12, %v99_v17  ;;  %v103_v20 = vadd.f32 %v162_v12, %v102_v18 }
  0xa2   :  { %107 = vst [vmem:[#allocation7 + $0x10] sm:$0xff] %v100_v19 }
  0xa3   :  { %108 = vst [vmem:[#allocation7 + $0x18] sm:$0xff] %v103_v20 }
  0xa4   :  { %121 = dma.vmem_to_hbm [thread:$0]  %s114_s25, 512, %s116_s28, [#allocation4], %s242_s20, %s242_s20, %s243_s21  }
  0xa5   :  { %239 = dma.done.wait [#allocation4], 512  }
  0xa6   :  { %240 = vsyncadd [#allocation4], 4294966784 }
  0xa7   :  { %126 = vsyncpa [#allocation3], 1 }
  0xa8   :  { %127 = vsyncpa [#allocation6], 1 }
  0xa9   :  { %128 = vsyncpa [#allocation4], 1 }

</bundles_post_ra>
